<compile_context>
chip_gen: v5e
topology: v5e:2x2
jax: 0.10.0
libtpu: 0.0.40
codegen_flags: <defaults>
</compile_context>

<pallas_src>
import jax
import jax.numpy as jnp
from jax import lax
from jax.experimental import pallas as pl
from jax.experimental.pallas import tpu as pltpu

EPS = 1e-5
LANE = 128


def _round_up(x, m):
    return ((x + m - 1) // m) * m


def residual_block_kernel(x_ref, w1_ref, g1_ref, be1_ref,
                          w2_ref, g2_ref, be2_ref,
                          ws_ref, bs_ref, out_ref,
                          xhalo_ref, hhalo_ref):
    """Fused ResidualBlock forward on one VMEM-resident tile.

    x_ref:   (N, L, Cin)  f32   channels-last input
    w1_ref:  (3, Cin, Cp) bf16  conv1 weights (tap, in, out)
    w2_ref:  (3, Cp, Cp)  bf16  conv2 weights
    ws_ref:  (Cin, Cp)    bf16  1x1 skip-conv weights
    g*/be*:  (1, Cp)      f32   BatchNorm affine params
    bs_ref:  (1, Cp)      f32   skip-conv bias
    out_ref: (N, L, Cp)   f32
    xhalo_ref / hhalo_ref: zero-haloed f32 staging scratch for the two
    kernel-3 'same' convolutions.
    """
    N, L, Cin = x_ref.shape
    Cp = out_ref.shape[-1]
    M = N * L
    inv_m = 1.0 / float(M)

    def fused_bn(h, g, be):
        # Training-mode BatchNorm1d: batch statistics (biased variance) over
        # the (N, L) axes per channel, fused into a single scale/shift FMA.
        # One reduction pass: var = E[x^2] - E[x]^2.
        mu = jnp.sum(h, axis=0, keepdims=True) * inv_m             # (1, Cp)
        ex2 = jnp.sum(h * h, axis=0, keepdims=True) * inv_m        # (1, Cp)
        var = ex2 - mu * mu
        scale = g * lax.rsqrt(var + EPS)
        shift = be - mu * scale
        return h * scale + shift

    # ---- skip branch (1x1 conv) first: written straight into out_ref so its
    #      live range ends before conv2 starts. ----
    x2d = x_ref[...].reshape(M, Cin)
    skip = jnp.dot(x2d.astype(jnp.bfloat16), ws_ref[...],
                   preferred_element_type=jnp.float32)             # (M, Cp) f32
    out_ref[...] = (skip + bs_ref[...]).reshape(N, L, Cp)

    # ---- stage x into a zero-haloed scratch ('same' padding, done once) ----
    zx = jnp.zeros((N, 1, Cin), jnp.float32)
    xhalo_ref[:, 0:1, :] = zx
    xhalo_ref[:, L + 1:L + 2, :] = zx
    xhalo_ref[:, 1:L + 1, :] = x_ref[...]

    # ---- conv1: 3 shifted (M, Cin) @ (Cin, Cp) bf16 matmuls, f32 accumulate.
    #      Conv bias omitted: exactly cancelled by the training-mode BN mean
    #      subtraction that follows. ----
    h = jnp.zeros((M, Cp), jnp.float32)
    for k in range(3):
        xs = xhalo_ref[:, k:k + L, :].reshape(M, Cin).astype(jnp.bfloat16)
        h = h + jnp.dot(xs, w1_ref[k], preferred_element_type=jnp.float32)

    # ---- BN1 + ReLU (f32) ----
    h = jnp.maximum(fused_bn(h, g1_ref[...], be1_ref[...]), 0.0)

    # ---- stage BN1/ReLU output into the second zero-haloed scratch ----
    zh = jnp.zeros((N, 1, Cp), jnp.float32)
    hhalo_ref[:, 0:1, :] = zh
    hhalo_ref[:, L + 1:L + 2, :] = zh
    hhalo_ref[:, 1:L + 1, :] = h.reshape(N, L, Cp)

    # ---- conv2 (bias again cancelled by BN2) ----
    h2 = jnp.zeros((M, Cp), jnp.float32)
    for k in range(3):
        hs = hhalo_ref[:, k:k + L, :].reshape(M, Cp).astype(jnp.bfloat16)
        h2 = h2 + jnp.dot(hs, w2_ref[k], preferred_element_type=jnp.float32)

    # ---- BN2 + residual add (out_ref already holds the skip branch) ----
    h2 = fused_bn(h2, g2_ref[...], be2_ref[...])
    out_ref[...] = out_ref[...] + h2.reshape(N, L, Cp)


def residual_block(x_ncl, params):
    """x_ncl: (N, Cin, L) float32 in PyTorch NCL layout. Returns (N, Cout, L)."""
    N, Cin, L = x_ncl.shape
    Cout = params['w1'].shape[2]
    Cp = _round_up(Cout, LANE)          # lane-dense hidden/output channel count

    def padc(a, axis):
        pad = [(0, 0)] * a.ndim
        pad[axis] = (0, Cp - a.shape[axis])
        return jnp.pad(a, pad)

    # channels-last activations; Cin (contraction dim) is left unpadded.
    x_nlc = jnp.transpose(x_ncl, (0, 2, 1))                        # (N, L, Cin)

    w1 = padc(params['w1'], 2).astype(jnp.bfloat16)                # (3, Cin, Cp)
    w2 = padc(padc(params['w2'], 2), 1).astype(jnp.bfloat16)       # (3, Cp, Cp)
    ws = padc(params['ws'], 1).astype(jnp.bfloat16)                # (Cin, Cp)
    g1, be1 = padc(params['g1'], 1), padc(params['be1'], 1)        # (1, Cp) f32
    g2, be2 = padc(params['g2'], 1), padc(params['be2'], 1)
    bs = padc(params['bs'], 1)

    vmem = pl.BlockSpec(memory_space=pltpu.MemorySpace.VMEM)
    out_nlc = pl.pallas_call(
        residual_block_kernel,
        out_shape=jax.ShapeDtypeStruct((N, L, Cp), jnp.float32),
        in_specs=[vmem] * 9,
        out_specs=vmem,
        scratch_shapes=[
            pltpu.VMEM((N, L + 2, Cin), jnp.float32),   # x halo buffer
            pltpu.VMEM((N, L + 2, Cp), jnp.float32),    # BN1/ReLU halo buffer
        ],
    )(x_nlc, w1, g1, be1, w2, g2, be2, ws, bs)

    out_nlc = out_nlc[:, :, :Cout]                     # drop channel padding
    return jnp.transpose(out_nlc, (0, 2, 1))           # back to NCL


def init_params(key, in_channels, out_channels):
    """Deterministic synthetic params mirroring ResidualBlock.__init_weights__."""
    k1, k2, k3, k4, k5 = jax.random.split(key, 5)
    # kaiming normal (relu): std = sqrt(2 / fan_in), fan_in = Cin * kernel
    std1 = (2.0 / (in_channels * 3)) ** 0.5
    std2 = (2.0 / (out_channels * 3)) ** 0.5
    stds = (2.0 / in_channels) ** 0.5
    return {
        # conv weights stored (K, Cin, Cout) for matmul-friendly access
        'w1': jax.random.normal(k1, (3, in_channels, out_channels), jnp.float32) * std1,
        'b1': jnp.zeros((1, out_channels), jnp.float32),   # zero; cancelled by BN anyway
        'g1': jax.random.uniform(k2, (1, out_channels), jnp.float32),
        'be1': jnp.zeros((1, out_channels), jnp.float32),
        'w2': jax.random.normal(k3, (3, out_channels, out_channels), jnp.float32) * std2,
        'b2': jnp.zeros((1, out_channels), jnp.float32),   # zero; cancelled by BN anyway
        'g2': jax.random.uniform(k4, (1, out_channels), jnp.float32),
        'be2': jnp.zeros((1, out_channels), jnp.float32),
        # skip 1x1 conv (PyTorch default init; synthetic values here)
        'ws': jax.random.normal(k5, (in_channels, out_channels), jnp.float32) * stds,
        'bs': jnp.zeros((1, out_channels), jnp.float32),
    }


def reference(x_ncl, params):
    """Pure-JAX f32 reference (lax.conv_general_dilated) for correctness check."""
    def conv1d(x, w_kio, b):  # w_kio: (K, Cin, Cout) -> OIH (Cout, Cin, K)
        w = jnp.transpose(w_kio, (2, 1, 0))
        y = lax.conv_general_dilated(
            x, w, window_strides=(1,), padding='SAME',
            dimension_numbers=('NCH', 'OIH', 'NCH'))
        return y + b.reshape(1, -1, 1)

    def bn(x, g, be):
        mu = jnp.mean(x, axis=(0, 2), keepdims=True)
        var = jnp.mean((x - mu) ** 2, axis=(0, 2), keepdims=True)
        return (x - mu) * lax.rsqrt(var + EPS) * g.reshape(1, -1, 1) + be.reshape(1, -1, 1)

    h = conv1d(x_ncl, params['w1'], params['b1'])
    h = jnp.maximum(bn(h, params['g1'], params['be1']), 0.0)
    h = conv1d(h, params['w2'], params['b2'])
    h = bn(h, params['g2'], params['be2'])
    skip = jnp.einsum('ncl,cd->ndl', x_ncl, params['ws']) + params['bs'].reshape(1, -1, 1)
    return h + skip


if __name__ == "__main__":
    key = jax.random.PRNGKey(0)
    kx, kp = jax.random.split(key)

    N, Cin, Cout, L = 2, 4, 8, 16
    x = jax.random.normal(kx, (N, Cin, L), jnp.float32)
    params = init_params(kp, Cin, Cout)

    out = jax.jit(residual_block)(x, params)
    out = jax.block_until_ready(out)

    ref = reference(x, params)
    assert out.shape == (N, Cout, L)
    # bf16 MXU operands (f32 accumulation) vs. a pure-f32 reference -> looser
    # tolerance than an all-f32 kernel; the math is unchanged.
    err = float(jnp.max(jnp.abs(out - ref)))
    assert jnp.allclose(out, ref, atol=8e-2, rtol=8e-2), f"max abs err = {err}"

    print("KERNEL_OK")
</pallas_src>

<mosaic_0001>
module attributes {stable_mosaic.version = 11 : i64} {
  func.func @residual_block_kernel(%arg0: memref<2x16x4xf32, #tpu.memory_space<vmem>>, %arg1: memref<3x4x128xbf16, #tpu.memory_space<vmem>>, %arg2: memref<1x128xf32, #tpu.memory_space<vmem>>, %arg3: memref<1x128xf32, #tpu.memory_space<vmem>>, %arg4: memref<3x128x128xbf16, #tpu.memory_space<vmem>>, %arg5: memref<1x128xf32, #tpu.memory_space<vmem>>, %arg6: memref<1x128xf32, #tpu.memory_space<vmem>>, %arg7: memref<4x128xbf16, #tpu.memory_space<vmem>>, %arg8: memref<1x128xf32, #tpu.memory_space<vmem>>, %arg9: memref<2x16x128xf32, #tpu.memory_space<vmem>>, %arg10: memref<2x18x4xf32, #tpu.memory_space<vmem>>, %arg11: memref<2x18x128xf32, #tpu.memory_space<vmem>>) attributes {dimension_semantics = [], scalar_prefetch = 0 : i64, scratch_operands = 2 : i64, tpu.core_type = #tpu.core_type<tc>} {
    %c0 = arith.constant 0 : index
    %c0_0 = arith.constant 0 : index
    %c0_1 = arith.constant 0 : index
    %0 = vector.load %arg0[%c0, %c0_0, %c0_1] : memref<2x16x4xf32, #tpu.memory_space<vmem>>, vector<2x16x4xf32>
    %1 = vector.shape_cast %0 : vector<2x16x4xf32> to vector<32x4xf32>
    %2 = arith.truncf %1 : vector<32x4xf32> to vector<32x4xbf16>
    %c0_2 = arith.constant 0 : index
    %c0_3 = arith.constant 0 : index
    %3 = vector.load %arg7[%c0_2, %c0_3] : memref<4x128xbf16, #tpu.memory_space<vmem>>, vector<4x128xbf16>
    %cst = arith.constant dense<0.000000e+00> : vector<32x128xf32>
    %4 = tpu.matmul %2, %3, %cst {dimension_numbers = #tpu.dot_dimension_numbers<[1], [0], [0], [1], [0, 0, 1, 1], [], []>} : vector<32x4xbf16>, vector<4x128xbf16>, vector<32x128xf32> -> vector<32x128xf32>
    %c0_4 = arith.constant 0 : index
    %c0_5 = arith.constant 0 : index
    %5 = vector.load %arg8[%c0_4, %c0_5] : memref<1x128xf32, #tpu.memory_space<vmem>>, vector<1x128xf32>
    %6 = vector.broadcast %5 : vector<1x128xf32> to vector<32x128xf32>
    %7 = arith.addf %4, %6 : vector<32x128xf32>
    %8 = vector.shape_cast %7 : vector<32x128xf32> to vector<2x16x128xf32>
    %c0_6 = arith.constant 0 : index
    %c0_7 = arith.constant 0 : index
    %c0_8 = arith.constant 0 : index
    %9 = vector.load %arg9[%c0_6, %c0_7, %c0_8] : memref<2x16x128xf32, #tpu.memory_space<vmem>>, vector<2x16x128xf32>
    tpu.vector_store %arg9[%c0_6, %c0_7, %c0_8], %8 {strides = array<i32>} : memref<2x16x128xf32, #tpu.memory_space<vmem>>, vector<2x16x128xf32>,
    %cst_9 = arith.constant 0.000000e+00 : f32
    %10 = vector.broadcast %cst_9 : f32 to vector<2x1x4xf32>
    %c0_10 = arith.constant 0 : index
    %c0_11 = arith.constant 0 : index
    %c0_12 = arith.constant 0 : index
    %11 = vector.load %arg10[%c0_10, %c0_11, %c0_12] : memref<2x18x4xf32, #tpu.memory_space<vmem>>, vector<2x1x4xf32>
    tpu.vector_store %arg10[%c0_10, %c0_11, %c0_12], %10 {strides = array<i32>} : memref<2x18x4xf32, #tpu.memory_space<vmem>>, vector<2x1x4xf32>,
    %c0_13 = arith.constant 0 : index
    %c17 = arith.constant 17 : index
    %c0_14 = arith.constant 0 : index
    %12 = vector.load %arg10[%c0_13, %c17, %c0_14] : memref<2x18x4xf32, #tpu.memory_space<vmem>>, vector<2x1x4xf32>
    tpu.vector_store %arg10[%c0_13, %c17, %c0_14], %10 {strides = array<i32>} : memref<2x18x4xf32, #tpu.memory_space<vmem>>, vector<2x1x4xf32>,
    %c0_15 = arith.constant 0 : index
    %c0_16 = arith.constant 0 : index
    %c0_17 = arith.constant 0 : index
    %13 = vector.load %arg0[%c0_15, %c0_16, %c0_17] : memref<2x16x4xf32, #tpu.memory_space<vmem>>, vector<2x16x4xf32>
    %c0_18 = arith.constant 0 : index
    %c1 = arith.constant 1 : index
    %c0_19 = arith.constant 0 : index
    %14 = vector.load %arg10[%c0_18, %c1, %c0_19] : memref<2x18x4xf32, #tpu.memory_space<vmem>>, vector<2x16x4xf32>
    tpu.vector_store %arg10[%c0_18, %c1, %c0_19], %13 {strides = array<i32>} : memref<2x18x4xf32, #tpu.memory_space<vmem>>, vector<2x16x4xf32>,
    %cst_20 = arith.constant 0.000000e+00 : f32
    %15 = vector.broadcast %cst_20 : f32 to vector<32x128xf32>
    %c0_21 = arith.constant 0 : index
    %c0_22 = arith.constant 0 : index
    %c0_23 = arith.constant 0 : index
    %16 = vector.load %arg10[%c0_21, %c0_22, %c0_23] : memref<2x18x4xf32, #tpu.memory_space<vmem>>, vector<2x16x4xf32>
    %17 = vector.shape_cast %16 : vector<2x16x4xf32> to vector<32x4xf32>
    %18 = arith.truncf %17 : vector<32x4xf32> to vector<32x4xbf16>
    %c0_24 = arith.constant 0 : index
    %c0_25 = arith.constant 0 : index
    %c0_26 = arith.constant 0 : index
    %19 = vector.load %arg1[%c0_24, %c0_25, %c0_26] : memref<3x4x128xbf16, #tpu.memory_space<vmem>>, vector<1x4x128xbf16>
    %20 = vector.shape_cast %19 : vector<1x4x128xbf16> to vector<4x128xbf16>
    %cst_27 = arith.constant dense<0.000000e+00> : vector<32x128xf32>
    %21 = tpu.matmul %18, %20, %cst_27 {dimension_numbers = #tpu.dot_dimension_numbers<[1], [0], [0], [1], [0, 0, 1, 1], [], []>} : vector<32x4xbf16>, vector<4x128xbf16>, vector<32x128xf32> -> vector<32x128xf32>
    %22 = arith.addf %15, %21 : vector<32x128xf32>
    %c0_28 = arith.constant 0 : index
    %c1_29 = arith.constant 1 : index
    %c0_30 = arith.constant 0 : index
    %23 = vector.load %arg10[%c0_28, %c1_29, %c0_30] : memref<2x18x4xf32, #tpu.memory_space<vmem>>, vector<2x16x4xf32>
    %24 = vector.shape_cast %23 : vector<2x16x4xf32> to vector<32x4xf32>
    %25 = arith.truncf %24 : vector<32x4xf32> to vector<32x4xbf16>
    %c1_31 = arith.constant 1 : index
    %c0_32 = arith.constant 0 : index
    %c0_33 = arith.constant 0 : index
    %26 = vector.load %arg1[%c1_31, %c0_32, %c0_33] : memref<3x4x128xbf16, #tpu.memory_space<vmem>>, vector<1x4x128xbf16>
    %27 = vector.shape_cast %26 : vector<1x4x128xbf16> to vector<4x128xbf16>
    %cst_34 = arith.constant dense<0.000000e+00> : vector<32x128xf32>
    %28 = tpu.matmul %25, %27, %cst_34 {dimension_numbers = #tpu.dot_dimension_numbers<[1], [0], [0], [1], [0, 0, 1, 1], [], []>} : vector<32x4xbf16>, vector<4x128xbf16>, vector<32x128xf32> -> vector<32x128xf32>
    %29 = arith.addf %22, %28 : vector<32x128xf32>
    %c0_35 = arith.constant 0 : index
    %c2 = arith.constant 2 : index
    %c0_36 = arith.constant 0 : index
    %30 = vector.load %arg10[%c0_35, %c2, %c0_36] : memref<2x18x4xf32, #tpu.memory_space<vmem>>, vector<2x16x4xf32>
    %31 = vector.shape_cast %30 : vector<2x16x4xf32> to vector<32x4xf32>
    %32 = arith.truncf %31 : vector<32x4xf32> to vector<32x4xbf16>
    %c2_37 = arith.constant 2 : index
    %c0_38 = arith.constant 0 : index
    %c0_39 = arith.constant 0 : index
    %33 = vector.load %arg1[%c2_37, %c0_38, %c0_39] : memref<3x4x128xbf16, #tpu.memory_space<vmem>>, vector<1x4x128xbf16>
    %34 = vector.shape_cast %33 : vector<1x4x128xbf16> to vector<4x128xbf16>
    %cst_40 = arith.constant dense<0.000000e+00> : vector<32x128xf32>
    %35 = tpu.matmul %32, %34, %cst_40 {dimension_numbers = #tpu.dot_dimension_numbers<[1], [0], [0], [1], [0, 0, 1, 1], [], []>} : vector<32x4xbf16>, vector<4x128xbf16>, vector<32x128xf32> -> vector<32x128xf32>
    %36 = arith.addf %29, %35 : vector<32x128xf32>
    %c0_41 = arith.constant 0 : index
    %c0_42 = arith.constant 0 : index
    %37 = vector.load %arg2[%c0_41, %c0_42] : memref<1x128xf32, #tpu.memory_space<vmem>>, vector<1x128xf32>
    %c0_43 = arith.constant 0 : index
    %c0_44 = arith.constant 0 : index
    %38 = vector.load %arg3[%c0_43, %c0_44] : memref<1x128xf32, #tpu.memory_space<vmem>>, vector<1x128xf32>
    %cst_45 = arith.constant dense<0.000000e+00> : vector<128xf32>
    %39 = vector.multi_reduction <add>, %36, %cst_45 [0] : vector<32x128xf32> to vector<128xf32>
    %40 = vector.shape_cast %39 : vector<128xf32> to vector<1x128xf32>
    %cst_46 = arith.constant 3.125000e-02 : f32
    %41 = vector.broadcast %cst_46 : f32 to vector<1x128xf32>
    %42 = arith.mulf %40, %41 : vector<1x128xf32>
    %43 = arith.mulf %36, %36 : vector<32x128xf32>
    %cst_47 = arith.constant dense<0.000000e+00> : vector<128xf32>
    %44 = vector.multi_reduction <add>, %43, %cst_47 [0] : vector<32x128xf32> to vector<128xf32>
    %45 = vector.shape_cast %44 : vector<128xf32> to vector<1x128xf32>
    %cst_48 = arith.constant 3.125000e-02 : f32
    %46 = vector.broadcast %cst_48 : f32 to vector<1x128xf32>
    %47 = arith.mulf %45, %46 : vector<1x128xf32>
    %48 = arith.mulf %42, %42 : vector<1x128xf32>
    %49 = arith.subf %47, %48 : vector<1x128xf32>
    %cst_49 = arith.constant 9.99999974E-6 : f32
    %50 = vector.broadcast %cst_49 : f32 to vector<1x128xf32>
    %51 = arith.addf %49, %50 : vector<1x128xf32>
    %52 = math.rsqrt %51 : vector<1x128xf32>
    %53 = arith.mulf %37, %52 : vector<1x128xf32>
    %54 = arith.mulf %42, %53 : vector<1x128xf32>
    %55 = arith.subf %38, %54 : vector<1x128xf32>
    %56 = vector.broadcast %53 : vector<1x128xf32> to vector<32x128xf32>
    %57 = arith.mulf %36, %56 : vector<32x128xf32>
    %58 = vector.broadcast %55 : vector<1x128xf32> to vector<32x128xf32>
    %59 = arith.addf %57, %58 : vector<32x128xf32>
    %cst_50 = arith.constant 0.000000e+00 : f32
    %60 = vector.broadcast %cst_50 : f32 to vector<32x128xf32>
    %61 = arith.maximumf %59, %60 : vector<32x128xf32>
    %cst_51 = arith.constant 0.000000e+00 : f32
    %62 = vector.broadcast %cst_51 : f32 to vector<2x1x128xf32>
    %c0_52 = arith.constant 0 : index
    %c0_53 = arith.constant 0 : index
    %c0_54 = arith.constant 0 : index
    %63 = vector.load %arg11[%c0_52, %c0_53, %c0_54] : memref<2x18x128xf32, #tpu.memory_space<vmem>>, vector<2x1x128xf32>
    tpu.vector_store %arg11[%c0_52, %c0_53, %c0_54], %62 {strides = array<i32>} : memref<2x18x128xf32, #tpu.memory_space<vmem>>, vector<2x1x128xf32>,
    %c0_55 = arith.constant 0 : index
    %c17_56 = arith.constant 17 : index
    %c0_57 = arith.constant 0 : index
    %64 = vector.load %arg11[%c0_55, %c17_56, %c0_57] : memref<2x18x128xf32, #tpu.memory_space<vmem>>, vector<2x1x128xf32>
    tpu.vector_store %arg11[%c0_55, %c17_56, %c0_57], %62 {strides = array<i32>} : memref<2x18x128xf32, #tpu.memory_space<vmem>>, vector<2x1x128xf32>,
    %65 = vector.shape_cast %61 : vector<32x128xf32> to vector<2x16x128xf32>
    %c0_58 = arith.constant 0 : index
    %c1_59 = arith.constant 1 : index
    %c0_60 = arith.constant 0 : index
    %66 = vector.load %arg11[%c0_58, %c1_59, %c0_60] : memref<2x18x128xf32, #tpu.memory_space<vmem>>, vector<2x16x128xf32>
    tpu.vector_store %arg11[%c0_58, %c1_59, %c0_60], %65 {strides = array<i32>} : memref<2x18x128xf32, #tpu.memory_space<vmem>>, vector<2x16x128xf32>,
    %cst_61 = arith.constant 0.000000e+00 : f32
    %67 = vector.broadcast %cst_61 : f32 to vector<32x128xf32>
    %c0_62 = arith.constant 0 : index
    %c0_63 = arith.constant 0 : index
    %c0_64 = arith.constant 0 : index
    %68 = vector.load %arg11[%c0_62, %c0_63, %c0_64] : memref<2x18x128xf32, #tpu.memory_space<vmem>>, vector<2x16x128xf32>
    %69 = vector.shape_cast %68 : vector<2x16x128xf32> to vector<32x128xf32>
    %70 = arith.truncf %69 : vector<32x128xf32> to vector<32x128xbf16>
    %c0_65 = arith.constant 0 : index
    %c0_66 = arith.constant 0 : index
    %c0_67 = arith.constant 0 : index
    %71 = vector.load %arg4[%c0_65, %c0_66, %c0_67] : memref<3x128x128xbf16, #tpu.memory_space<vmem>>, vector<1x128x128xbf16>
    %72 = vector.shape_cast %71 : vector<1x128x128xbf16> to vector<128x128xbf16>
    %cst_68 = arith.constant dense<0.000000e+00> : vector<32x128xf32>
    %73 = tpu.matmul %70, %72, %cst_68 {dimension_numbers = #tpu.dot_dimension_numbers<[1], [0], [0], [1], [0, 0, 1, 1], [], []>} : vector<32x128xbf16>, vector<128x128xbf16>, vector<32x128xf32> -> vector<32x128xf32>
    %74 = arith.addf %67, %73 : vector<32x128xf32>
    %c0_69 = arith.constant 0 : index
    %c1_70 = arith.constant 1 : index
    %c0_71 = arith.constant 0 : index
    %75 = vector.load %arg11[%c0_69, %c1_70, %c0_71] : memref<2x18x128xf32, #tpu.memory_space<vmem>>, vector<2x16x128xf32>
    %76 = vector.shape_cast %75 : vector<2x16x128xf32> to vector<32x128xf32>
    %77 = arith.truncf %76 : vector<32x128xf32> to vector<32x128xbf16>
    %c1_72 = arith.constant 1 : index
    %c0_73 = arith.constant 0 : index
    %c0_74 = arith.constant 0 : index
    %78 = vector.load %arg4[%c1_72, %c0_73, %c0_74] : memref<3x128x128xbf16, #tpu.memory_space<vmem>>, vector<1x128x128xbf16>
    %79 = vector.shape_cast %78 : vector<1x128x128xbf16> to vector<128x128xbf16>
    %cst_75 = arith.constant dense<0.000000e+00> : vector<32x128xf32>
    %80 = tpu.matmul %77, %79, %cst_75 {dimension_numbers = #tpu.dot_dimension_numbers<[1], [0], [0], [1], [0, 0, 1, 1], [], []>} : vector<32x128xbf16>, vector<128x128xbf16>, vector<32x128xf32> -> vector<32x128xf32>
    %81 = arith.addf %74, %80 : vector<32x128xf32>
    %c0_76 = arith.constant 0 : index
    %c2_77 = arith.constant 2 : index
    %c0_78 = arith.constant 0 : index
    %82 = vector.load %arg11[%c0_76, %c2_77, %c0_78] : memref<2x18x128xf32, #tpu.memory_space<vmem>>, vector<2x16x128xf32>
    %83 = vector.shape_cast %82 : vector<2x16x128xf32> to vector<32x128xf32>
    %84 = arith.truncf %83 : vector<32x128xf32> to vector<32x128xbf16>
    %c2_79 = arith.constant 2 : index
    %c0_80 = arith.constant 0 : index
    %c0_81 = arith.constant 0 : index
    %85 = vector.load %arg4[%c2_79, %c0_80, %c0_81] : memref<3x128x128xbf16, #tpu.memory_space<vmem>>, vector<1x128x128xbf16>
    %86 = vector.shape_cast %85 : vector<1x128x128xbf16> to vector<128x128xbf16>
    %cst_82 = arith.constant dense<0.000000e+00> : vector<32x128xf32>
    %87 = tpu.matmul %84, %86, %cst_82 {dimension_numbers = #tpu.dot_dimension_numbers<[1], [0], [0], [1], [0, 0, 1, 1], [], []>} : vector<32x128xbf16>, vector<128x128xbf16>, vector<32x128xf32> -> vector<32x128xf32>
    %88 = arith.addf %81, %87 : vector<32x128xf32>
    %c0_83 = arith.constant 0 : index
    %c0_84 = arith.constant 0 : index
    %89 = vector.load %arg5[%c0_83, %c0_84] : memref<1x128xf32, #tpu.memory_space<vmem>>, vector<1x128xf32>
    %c0_85 = arith.constant 0 : index
    %c0_86 = arith.constant 0 : index
    %90 = vector.load %arg6[%c0_85, %c0_86] : memref<1x128xf32, #tpu.memory_space<vmem>>, vector<1x128xf32>
    %cst_87 = arith.constant dense<0.000000e+00> : vector<128xf32>
    %91 = vector.multi_reduction <add>, %88, %cst_87 [0] : vector<32x128xf32> to vector<128xf32>
    %92 = vector.shape_cast %91 : vector<128xf32> to vector<1x128xf32>
    %cst_88 = arith.constant 3.125000e-02 : f32
    %93 = vector.broadcast %cst_88 : f32 to vector<1x128xf32>
    %94 = arith.mulf %92, %93 : vector<1x128xf32>
    %95 = arith.mulf %88, %88 : vector<32x128xf32>
    %cst_89 = arith.constant dense<0.000000e+00> : vector<128xf32>
    %96 = vector.multi_reduction <add>, %95, %cst_89 [0] : vector<32x128xf32> to vector<128xf32>
    %97 = vector.shape_cast %96 : vector<128xf32> to vector<1x128xf32>
    %cst_90 = arith.constant 3.125000e-02 : f32
    %98 = vector.broadcast %cst_90 : f32 to vector<1x128xf32>
    %99 = arith.mulf %97, %98 : vector<1x128xf32>
    %100 = arith.mulf %94, %94 : vector<1x128xf32>
    %101 = arith.subf %99, %100 : vector<1x128xf32>
    %cst_91 = arith.constant 9.99999974E-6 : f32
    %102 = vector.broadcast %cst_91 : f32 to vector<1x128xf32>
    %103 = arith.addf %101, %102 : vector<1x128xf32>
    %104 = math.rsqrt %103 : vector<1x128xf32>
    %105 = arith.mulf %89, %104 : vector<1x128xf32>
    %106 = arith.mulf %94, %105 : vector<1x128xf32>
    %107 = arith.subf %90, %106 : vector<1x128xf32>
    %108 = vector.broadcast %105 : vector<1x128xf32> to vector<32x128xf32>
    %109 = arith.mulf %88, %108 : vector<32x128xf32>
    %110 = vector.broadcast %107 : vector<1x128xf32> to vector<32x128xf32>
    %111 = arith.addf %109, %110 : vector<32x128xf32>
    %c0_92 = arith.constant 0 : index
    %c0_93 = arith.constant 0 : index
    %c0_94 = arith.constant 0 : index
    %112 = vector.load %arg9[%c0_92, %c0_93, %c0_94] : memref<2x16x128xf32, #tpu.memory_space<vmem>>, vector<2x16x128xf32>
    %113 = vector.shape_cast %111 : vector<32x128xf32> to vector<2x16x128xf32>
    %114 = arith.addf %112, %113 : vector<2x16x128xf32>
    %c0_95 = arith.constant 0 : index
    %c0_96 = arith.constant 0 : index
    %c0_97 = arith.constant 0 : index
    %115 = vector.load %arg9[%c0_95, %c0_96, %c0_97] : memref<2x16x128xf32, #tpu.memory_space<vmem>>, vector<2x16x128xf32>
    tpu.vector_store %arg9[%c0_95, %c0_96, %c0_97], %114 {strides = array<i32>} : memref<2x16x128xf32, #tpu.memory_space<vmem>>, vector<2x16x128xf32>,
    return
  }
}

</mosaic_0001>

<bundles_post_ra>
// kernel: residual_block.1
= control target key start
LH: loop header
LB: loop body
LE: loop exit
PB: predicated region body
PF: predicated region fallthrough
CT: control target
= control target key end

     0   :  { %vm51_vm0 = vcmask 1041408   ;;  %vm44_vm1 = vcmask 31744   ;;  %vm78_vm2 = vcmask 24576   ;;  %v791_v8 = vmov 0.0   ;;  %s1037_s1 = inlined_call_operand.vmem [shape: bf16[3,4,128], index: 1, kind: input, shape index: {}]   ;;  %s1038_s0 = inlined_call_operand.vmem [shape: f32[2,16,4], index: 0, kind: input, shape index: {}]   ;;  %s1039_s8 = inlined_call_operand.vmem [shape: f32[1,128], index: 8, kind: input, shape index: {}]   ;;  %s1040_s7 = inlined_call_operand.vmem [shape: bf16[4,128], index: 7, kind: input, shape index: {}]   ;;  %s1041_s4 = inlined_call_operand.vmem [shape: bf16[3,128,128], index: 4, kind: input, shape index: {}]   ;;  %s1042_s2 = inlined_call_operand.vmem [shape: f32[1,128], index: 2, kind: input, shape index: {}]   ;;  %s1043_s3 = inlined_call_operand.vmem [shape: f32[1,128], index: 3, kind: input, shape index: {}]   ;;  %s1044_s5 = inlined_call_operand.vmem [shape: f32[1,128], index: 5, kind: input, shape index: {}]   ;;  %s1045_s6 = inlined_call_operand.vmem [shape: f32[1,128], index: 6, kind: input, shape index: {}]   ;;  %s1046_s9 = inlined_call_operand.vmem [shape: f32[2,16,128], index: 9, kind: output, shape index: {}]  }
   0x1   :  { %v617_v0 = vld [vmem:[%s1037_s1 + $0x2] sm:$0x3]  ;;  %v97_v1 = vld [vmem:[%s1037_s1] sm:$0x3]  ;;  %v622_v2 = vld [vmem:[%s1037_s1 + $0x4] sm:$0x3] }
   0x2   :  { %v113_v3 = vsel %vm51_vm0, %v617_v0, 0  ;;  %v141_v4 = vsel %vm51_vm0, %v97_v1, 0  ;;  %v177_v5 = vsel %vm51_vm0, %v622_v2, 0  ;;  %v857_v6 = vld [vmem:[%s1038_s0] sm:$0xff]  ;;  %v862_v7 = vld [vmem:[%s1038_s0 + $0x8] sm:$0xff]  ;;  %v875_v10 = vld [vmem:[%s1038_s0 + $0x10] sm:$0xff] }
   0x3   :  { %122 = vmatpush.bf16.msra.mxu1 %v113_v3  ;;  %150 = vmatpush.bf16.msra.mxu2 %v141_v4  ;;  %87 = vst.msk [vmem:[#allocation2 + $0x1] sm:$0xff] %vm44_vm1, %v857_v6  ;;  %v880_v13 = vld [vmem:[%s1038_s0 + $0x18] sm:$0xff]  ;;  %v39_v40 = vld [vmem:[%s1040_s7] sm:$0x3]  ;;  %v37_v44 = vpack.c.bf16 %v862_v7, %v857_v6  ;;  %v767_v55 = vld [vmem:[%s1041_s4 + $0x70] sm:$0xff] }
   0x4   :  { %186 = vmatpush.bf16.msra.mxu3 %v177_v5  ;;  %88 = vst.msk [vmem:[#allocation2 + $0x9] sm:$0xff] %vm44_vm1, %v862_v7  ;;  %v53_v42 = vsel %vm51_vm0, %v39_v40, 0  ;;  %v768_v47 = vld [vmem:[%s1041_s4 + $0x78] sm:$0xff]  ;;  %v766_v1 = vld [vmem:[%s1041_s4 + $0x68] sm:$0xff]  ;;  %v775_v6 = vld [vmem:[%s1041_s4 + $0xb0] sm:$0xff] }
   0x5   :  { %79 = vst.msk [vmem:[#allocation2] sm:$0x1] %vm78_vm2, %v791_v8  ;;  %62 = vmatpush.bf16.msra.mxu0 %v53_v42  ;;  %v776_v63 = vld [vmem:[%s1041_s4 + $0xb8] sm:$0xff]  ;;  %v759_v7 = vld [vmem:[%s1041_s4 + $0x30] sm:$0xff] }
   0x6   :  { %80 = vst.msk [vmem:[#allocation2 + $0x18] sm:$0x1] %vm78_vm2, %v791_v8  ;;  %v760_v0 = vld [vmem:[%s1041_s4 + $0x38] sm:$0xff] }
   0x7   :  { %81 = vst.msk [vmem:[#allocation2 + $0x11] sm:$0x1] %vm78_vm2, %v791_v8  ;;  %520 = vmatpush.bf16.msrb.mxu2 %v776_v63  ;;  %430 = vmatpush.bf16.msrb.mxu1 %v760_v0 }
   0x8   :  { %82 = vst.msk [vmem:[#allocation2 + $0x29] sm:$0x1] %vm78_vm2, %v791_v8  ;;  %615 = vmatmul.msk.bf16.vlgmr.msra.gmra.mxu0 %vm44_vm1, %v37_v44  ;;  %777 = vmatpush.bf16.msrb.mxu3 %v768_v47 }
   0x9   :  { %262 = vst [vmem:[#allocation3] sm:$0x1] %v791_v8  ;;  %363 = vmatpush.bf16.msrb.mxu0 %v768_v47 }
   0xa   :  { %v98_v9 = vld [vmem:[#allocation2 + $0x1] sm:$0xff]  ;;  %263 = vst [vmem:[#allocation3 + $0x18] sm:$0x1] %v791_v8 }
   0xb   :  { %v99_v11 = vld [vmem:[#allocation2 + $0x9] sm:$0xff]  ;;  %264 = vst [vmem:[#allocation3 + $0x11] sm:$0x1] %v791_v8  ;;  %521 = vmatpush.bf16.msrb.mxu2 %v775_v6  ;;  %431 = vmatpush.bf16.msrb.mxu1 %v759_v7 }
   0xc   :  { %v92_v12 = vld [vmem:[#allocation2 + $0x8] sm:$0xff]  ;;  %v102_v14 = vpack.c.bf16 %v99_v11, %v98_v9  ;;  %v91_v15 = vld [vmem:[#allocation2] sm:$0xff]  ;;  %265 = vst [vmem:[#allocation3 + $0x29] sm:$0x1] %v791_v8  ;;  %778 = vmatpush.bf16.msrb.mxu3 %v767_v55 }
   0xd   :  { %v162_v16 = vld [vmem:[#allocation2 + $0x2] sm:$0xff]  ;;  %v95_v17 = vpack.c.bf16 %v92_v12, %v91_v15  ;;  %89 = vst.msk [vmem:[#allocation2 + $0x19] sm:$0xff] %vm44_vm1, %v875_v10  ;;  %364 = vmatpush.bf16.msrb.mxu0 %v767_v55  ;;  %v38_v12 = vpack.c.bf16 %v880_v13, %v875_v10 }
   0xe   :  { %618 = vmatmul.msk.bf16.vlgmr.msra.gmra.mxu1 %vm44_vm1, %v102_v14  ;;  %v163_v18 = vld [vmem:[#allocation2 + $0xa] sm:$0xff]  ;;  %90 = vst.msk [vmem:[#allocation2 + $0x21] sm:$0xff] %vm44_vm1, %v880_v13  ;;  %v765_v8 = vld [vmem:[%s1041_s4 + $0x60] sm:$0xff] }
   0xf   :  { %620 = vmatmul.msk.bf16.vlgmr.msra.gmra.mxu2 %vm44_vm1, %v95_v17  ;;  %v166_v19 = vpack.c.bf16 %v163_v18, %v162_v16  ;;  %v774_v16 = vld [vmem:[%s1041_s4 + $0xa8] sm:$0xff]  ;;  %v764_v18 = vld [vmem:[%s1041_s4 + $0x58] sm:$0xff] }
  0x10   :  { %779 = vmatpush.bf16.msrb.mxu3 %v766_v1  ;;  %v758_v17 = vld [vmem:[%s1041_s4 + $0x28] sm:$0xff]  ;;  %522 = vmatpush.bf16.msrb.mxu2 %v774_v16 }
  0x11   :  { %623 = vmatmul.msk.bf16.vlgmr.msra.gmra.mxu3 %vm44_vm1, %v166_v19  ;;  %365 = vmatpush.bf16.msrb.mxu0 %v766_v1 }
  0x12   :  { %432 = vmatpush.bf16.msrb.mxu1 %v758_v17 }
  0x14   :  { %v100_v20 = vld [vmem:[#allocation2 + $0x19] sm:$0xff]  ;;  %780 = vmatpush.bf16.msrb.mxu3 %v765_v8 }
  0x15   :  { %v101_v21 = vld [vmem:[#allocation2 + $0x21] sm:$0xff]  ;;  %v93_v22 = vld [vmem:[#allocation2 + $0x18] sm:$0xff]  ;;  %366 = vmatpush.bf16.msrb.mxu0 %v765_v8 }
  0x16   :  { %v94_v23 = vld [vmem:[#allocation2 + $0x20] sm:$0xff]  ;;  %v103_v24 = vpack.c.bf16 %v101_v21, %v100_v20 }
  0x17   :  { %v164_v25 = vld [vmem:[#allocation2 + $0x1a] sm:$0xff]  ;;  %v165_v26 = vld [vmem:[#allocation2 + $0x22] sm:$0xff]  ;;  %v96_v27 = vpack.c.bf16 %v94_v23, %v93_v22  ;;  %v763_v23 = vld [vmem:[%s1041_s4 + $0x50] sm:$0xff] }
  0x18   :  { %v167_v28 = vpack.c.bf16 %v165_v26, %v164_v25  ;;  %616 = vmatmul.msk.bf16.gmra.mxu0 %vm44_vm1, %v38_v12  ;;  %781 = vmatpush.bf16.msrb.mxu3 %v764_v18  ;;  %v773_v21 = vld [vmem:[%s1041_s4 + $0xa0] sm:$0xff] }
  0x19   :  { %367 = vmatpush.bf16.msrb.mxu0 %v764_v18  ;;  %v757_v22 = vld [vmem:[%s1041_s4 + $0x20] sm:$0xff]  ;;  %523 = vmatpush.bf16.msrb.mxu2 %v773_v21 }
  0x1a   :  { %433 = vmatpush.bf16.msrb.mxu1 %v757_v22 }
  0x1c   :  { %782 = vmatpush.bf16.msrb.mxu3 %v763_v23 }
  0x1d   :  { %368 = vmatpush.bf16.msrb.mxu0 %v763_v23 }
  0x1e   :  { %619 = vmatmul.msk.bf16.gmra.mxu1 %vm44_vm1, %v103_v24 }
  0x1f   :  { %621 = vmatmul.msk.bf16.gmra.mxu2 %vm44_vm1, %v96_v27 }
  0x21   :  { %624 = vmatmul.msk.bf16.gmra.mxu3 %vm44_vm1, %v167_v28  ;;  %v772_v28 = vld [vmem:[%s1041_s4 + $0x98] sm:$0xff] }
  0x22   :  { %524 = vmatpush.bf16.msrb.mxu2 %v772_v28 }
  0x85   :  { %v1004_v18 = vpop.f32.mrf.mxu0 }
  0x8b   :  { %v124_v29 = vpop.f32.mrf.mxu1 }
  0x92   :  { %v152_v30 = vpop.f32.mrf.mxu2 }
  0x93   :  { %v126_v32 = vpop.f32.mrf.mxu1  ;;  %v153_v38 = vadd.f32 %v152_v30, %v124_v29  ;;  %v756_v29 = vld [vmem:[%s1041_s4 + $0x18] sm:$0xff]  ;;  %v762_v30 = vld [vmem:[%s1041_s4 + $0x48] sm:$0xff] }
  0x94   :  { %v188_v31 = vpop.f32.mrf.mxu3  ;;  %434 = vmatpush.bf16.msrb.mxu1 %v756_v29  ;;  %369 = vmatpush.bf16.msrb.mxu0 %v762_v30 }
  0x95   :  { %v900_v45 = vadd.f32 %v188_v31, %v153_v38  ;;  %783 = vmatpush.bf16.msrb.mxu3 %v762_v30  ;;  %v769_v38 = vld [vmem:[%s1041_s4 + $0x80] sm:$0xff] }
  0x97   :  { %v214_v51 = vmul.f32 %v900_v45, %v900_v45 }
  0x9a   :  { %v154_v33 = vpop.f32.mrf.mxu2 }
  0x9b   :  { %v129_v35 = vpop.f32.mrf.mxu1  ;;  %v155_v36 = vadd.f32 %v154_v33, %v126_v32  ;;  %v771_v33 = vld [vmem:[%s1041_s4 + $0x90] sm:$0xff] }
  0x9c   :  { %v190_v34 = vpop.f32.mrf.mxu3  ;;  %525 = vmatpush.bf16.msrb.mxu2 %v771_v33 }
  0x9d   :  { %v896_v43 = vadd.f32 %v190_v34, %v155_v36  ;;  %v755_v34 = vld [vmem:[%s1041_s4 + $0x10] sm:$0xff]  ;;  %v770_v36 = vld [vmem:[%s1041_s4 + $0x88] sm:$0xff] }
  0x9e   :  { %435 = vmatpush.bf16.msrb.mxu1 %v755_v34 }
  0x9f   :  { %v215_v48 = vmul.f32 %v896_v43, %v896_v43  ;;  %v204_v52 = vadd.f32 %v896_v43, %v900_v45 }
  0xa0   :  { %526 = vmatpush.bf16.msrb.mxu2 %v770_v36 }
  0xa1   :  { %v218_v57 = vadd.f32 %v215_v48, %v214_v51  ;;  %v202_v48 = vld [vmem:[%s1042_s2] sm:$0x1] }
  0xa2   :  { %v157_v37 = vpop.f32.mrf.mxu2 }
  0xa3   :  { %v158_v39 = vadd.f32 %v157_v37, %v129_v35  ;;  %v131_v49 = vpop.f32.mrf.mxu1  ;;  %v761_v35 = vld [vmem:[%s1041_s4 + $0x40] sm:$0xff]  ;;  %v754_v37 = vld [vmem:[%s1041_s4 + $0x8] sm:$0xff] }
  0xa4   :  { %v193_v41 = vpop.f32.mrf.mxu3  ;;  %370 = vmatpush.bf16.msrb.mxu0 %v761_v35  ;;  %784 = vmatpush.bf16.msrb.mxu3 %v761_v35 }
  0xa5   :  { %v902_v46 = vadd.f32 %v193_v41, %v158_v39  ;;  %436 = vmatpush.bf16.msrb.mxu1 %v754_v37  ;;  %v753_v39 = vld [vmem:[%s1041_s4] sm:$0xff]  ;;  %527 = vmatpush.bf16.msrb.mxu2 %v769_v38 }
  0xa7   :  { %v216_v53 = vmul.f32 %v902_v46, %v902_v46  ;;  %v205_v58 = vadd.f32 %v204_v52, %v902_v46  ;;  %v203_v52 = vld [vmem:[%s1043_s3] sm:$0x1] }
  0xa9   :  { %v219_v60 = vadd.f32 %v218_v57, %v216_v53  ;;  %437 = vmatpush.bf16.msrb.mxu1 %v753_v39 }
  0xaa   :  { %v159_v50 = vpop.f32.mrf.mxu2 }
  0xab   :  { %v160_v54 = vadd.f32 %v159_v50, %v131_v49 }
  0xac   :  { %v195_v56 = vpop.f32.mrf.mxu3 }
  0xad   :  { %v920_v59 = vadd.f32 %v195_v56, %v160_v54 }
  0xaf   :  { %v206_v61 = vadd.f32 %v205_v58, %v920_v59  ;;  %v217_v62 = vmul.f32 %v920_v59, %v920_v59 }
  0xb1   :  { %v207_v2 = vrot.slane %v206_v61, 4  ;;  %v220_v3 = vadd.f32 %v219_v60, %v217_v62 }
  0xb3   :  { %v208_v4 = vadd.f32 %v207_v2, %v206_v61  ;;  %v221_v5 = vrot.slane %v220_v3, 4 }
  0xb5   :  { %v209_v9 = vrot.slane %v208_v4, 2  ;;  %v222_v11 = vadd.f32 %v221_v5, %v220_v3 }
  0xb7   :  { %v210_v14 = vadd.f32 %v209_v9, %v208_v4  ;;  %v223_v15 = vrot.slane %v222_v11, 2 }
  0xb9   :  { %v211_v19 = vrot.slane %v210_v14, 1  ;;  %v224_v20 = vadd.f32 %v223_v15, %v222_v11 }
  0xbb   :  { %v212_v10 = vadd.f32 %v211_v19, %v210_v14  ;;  %v225_v13 = vrot.slane %v224_v20, 1  ;;  %v1006_v19 = vpop.f32.mrf.mxu0 }
  0xbd   :  { %v213_v24 = vmul.f32 0.03125, %v212_v10  ;;  %v226_v25 = vadd.f32 %v225_v13, %v224_v20 }
  0xbf   :  { %v227_v26 = vmul.f32 0.03125, %v226_v25  ;;  %v228_v27 = vmul.f32 %v213_v24, %v213_v24 }
  0xc1   :  { %v229_v31 = vsub.f32 %v227_v26, %v228_v27 }
  0xc3   :  { %v230_v32 = vadd.f32 1e-05, %v229_v31  ;;  %v1008_v20 = vpop.f32.mrf.mxu0 }
  0xc5   :  { %787 = vrsqrt.f32 %v230_v32  ;;  %vm237_vm4 = vweird.f32 %v230_v32 }
  0xcb   :  { %v788_v40 = vpop.eup %787  ;;  %v1010_v10 = vpop.f32.mrf.mxu0 }
  0xcc   :  { %v232_v41 = vmul.f32 %v788_v40, %v230_v32  ;;  %vm238_vm3 = vweird.f32 %v788_v40 }
  0xcd   :  { %vm239_vm5 = vmor %vm237_vm4, %vm238_vm3 }
  0xce   :  { %v233_v42 = vmul.f32 %v788_v40, %v232_v41 }
  0xd0   :  { %v234_v44 = vmul.f32 0.5, %v233_v42 }
  0xd2   :  { %v235_v47 = vsub.f32 1.5, %v234_v44 }
  0xd4   :  { %v236_v49 = vmul.f32 %v788_v40, %v235_v47 }
  0xd6   :  { %v240_v50 = vsel %vm239_vm5, %v788_v40, %v236_v49 }
  0xd7   :  { %v241_v51 = vmul.f32 %v240_v50, %v202_v48 }
  0xd9   :  { %v242_v53 = vmul.f32 %v241_v51, %v213_v24  ;;  %v245_v54 = vperm.slane %v241_v51, 0 }
  0xdb   :  { %v243_v55 = vsub.f32 %v203_v52, %v242_v53  ;;  %v247_v56 = vmul.f32 %v245_v54, %v900_v45  ;;  %v248_v57 = vmul.f32 %v245_v54, %v896_v43  ;;  %v249_v58 = vmul.f32 %v245_v54, %v902_v46 }
  0xdc   :  { %v250_v60 = vmul.f32 %v245_v54, %v920_v59 }
  0xdd   :  { %v252_v61 = vperm.slane %v243_v55, 0 }
  0xdf   :  { %v254_v62 = vadd.f32 %v252_v61, %v247_v56  ;;  %v255_v63 = vadd.f32 %v252_v61, %v248_v57  ;;  %v256_v0 = vadd.f32 %v252_v61, %v249_v58  ;;  %v257_v1 = vadd.f32 %v252_v61, %v250_v60 }
  0xe1   :  { %v258_v2 = vmax.f32 %v254_v62, 0.0  ;;  %v259_v3 = vmax.f32 %v255_v63, 0.0  ;;  %v260_v4 = vmax.f32 %v256_v0, 0.0  ;;  %v261_v5 = vmax.f32 %v257_v1, 0.0 }
  0xe3   :  { %266 = vst [vmem:[#allocation3 + $0x1] sm:$0xff] %v258_v2  ;;  %v296_v6 = vpack.c.bf16 %v259_v3, %v258_v2  ;;  %v297_v7 = vpack.c.bf16 %v261_v5, %v260_v4 }
  0xe4   :  { %267 = vst [vmem:[#allocation3 + $0x9] sm:$0xff] %v259_v3 }
  0xe5   :  { %268 = vst [vmem:[#allocation3 + $0x19] sm:$0xff] %v260_v4  ;;  %371 = vmatmul.bf16.vlgmr.msrb.gmra.mxu0 %v296_v6  ;;  %376 = vmatmul.bf16.vlgmr.msrb.gmra.mxu3 %v297_v7 }
  0xe6   :  { %269 = vst [vmem:[#allocation3 + $0x21] sm:$0xff] %v261_v5 }
  0xea   :  { %v270_v43 = vld [vmem:[#allocation3] sm:$0xff] }
  0xeb   :  { %v271_v45 = vld [vmem:[#allocation3 + $0x8] sm:$0xff] }
  0xec   :  { %v449_v46 = vld [vmem:[#allocation3 + $0x2] sm:$0xff]  ;;  %v450_v59 = vld [vmem:[#allocation3 + $0xa] sm:$0xff]  ;;  %v274_v8 = vpack.c.bf16 %v271_v45, %v270_v43  ;;  %v272_v11 = vld [vmem:[#allocation3 + $0x18] sm:$0xff] }
  0xed   :  { %v453_v9 = vpack.c.bf16 %v450_v59, %v449_v46  ;;  %v273_v12 = vld [vmem:[#allocation3 + $0x20] sm:$0xff] }
  0xee   :  { %438 = vmatmul.bf16.vlgmr.msrb.gmra.mxu1 %v274_v8  ;;  %v451_v14 = vld [vmem:[#allocation3 + $0x1a] sm:$0xff]  ;;  %v452_v15 = vld [vmem:[#allocation3 + $0x22] sm:$0xff]  ;;  %v275_v16 = vpack.c.bf16 %v273_v12, %v272_v11  ;;  %v543_v8 = vld [vmem:[%s1044_s5] sm:$0x1] }
  0xef   :  { %528 = vmatmul.bf16.vlgmr.msrb.gmra.mxu2 %v453_v9  ;;  %v454_v17 = vpack.c.bf16 %v452_v15, %v451_v14  ;;  %v544_v14 = vld [vmem:[%s1045_s6] sm:$0x1] }
  0xfe   :  { %443 = vmatmul.bf16.gmra.mxu1 %v275_v16 }
  0xff   :  { %533 = vmatmul.bf16.gmra.mxu2 %v454_v17  ;;  %v786_v17 = vld [vmem:[%s1039_s8] ss:$0 sm:$0xff] }
 0x162   :  { %v372_v23 = vpop.f32.mrf.mxu0 }
 0x168   :  { %v377_v26 = vpop.f32.mrf.mxu3 }
 0x16a   :  { %v374_v27 = vpop.f32.mrf.mxu0 }
 0x16b   :  { %v439_v13 = vpop.f32.mrf.mxu1 }
 0x16c   :  { %v440_v30 = vadd.f32 %v439_v13, %v372_v23 }
 0x170   :  { %v379_v37 = vpop.f32.mrf.mxu3 }
 0x172   :  { %v529_v21 = vpop.f32.mrf.mxu2 }
 0x173   :  { %v441_v22 = vpop.f32.mrf.mxu1  ;;  %v539_v33 = vadd.f32 %v529_v21, %v440_v30 }
 0x174   :  { %v442_v28 = vadd.f32 %v441_v22, %v374_v27  ;;  %v67_v27 = vadd.f32 %v786_v17, %v1006_v19 }
 0x175   :  { %v555_v38 = vmul.f32 %v539_v33, %v539_v33 }
 0x17a   :  { %v531_v24 = vpop.f32.mrf.mxu2 }
 0x17b   :  { %v444_v25 = vpop.f32.mrf.mxu1  ;;  %v540_v31 = vadd.f32 %v531_v24, %v442_v28  ;;  %v70_v28 = vadd.f32 %v786_v17, %v1008_v20 }
 0x17c   :  { %v445_v32 = vadd.f32 %v444_v25, %v377_v26  ;;  %v65_v26 = vadd.f32 %v786_v17, %v1004_v18 }
 0x17d   :  { %v556_v36 = vmul.f32 %v540_v31, %v540_v31  ;;  %v545_v39 = vadd.f32 %v540_v31, %v539_v33 }
 0x17f   :  { %v559_v44 = vadd.f32 %v556_v36, %v555_v38  ;;  %v72_v36 = vadd.f32 %v786_v17, %v1010_v10 }
 0x182   :  { %v534_v29 = vpop.f32.mrf.mxu2 }
 0x183   :  { %v541_v34 = vadd.f32 %v534_v29, %v445_v32  ;;  %v446_v35 = vpop.f32.mrf.mxu1 }
 0x184   :  { %v447_v41 = vadd.f32 %v446_v35, %v379_v37 }
 0x185   :  { %v557_v40 = vmul.f32 %v541_v34, %v541_v34  ;;  %v546_v47 = vadd.f32 %v545_v39, %v541_v34 }
 0x187   :  { %v560_v49 = vadd.f32 %v559_v44, %v557_v40 }
 0x18a   :  { %v536_v42 = vpop.f32.mrf.mxu2 }
 0x18b   :  { %v542_v48 = vadd.f32 %v536_v42, %v447_v41 }
 0x18d   :  { %v547_v50 = vadd.f32 %v546_v47, %v542_v48  ;;  %v558_v51 = vmul.f32 %v542_v48, %v542_v48 }
 0x18f   :  { %v548_v52 = vrot.slane %v547_v50, 4  ;;  %v561_v53 = vadd.f32 %v560_v49, %v558_v51 }
 0x191   :  { %v549_v54 = vadd.f32 %v548_v52, %v547_v50  ;;  %v562_v55 = vrot.slane %v561_v53, 4 }
 0x193   :  { %v550_v56 = vrot.slane %v549_v54, 2  ;;  %v563_v57 = vadd.f32 %v562_v55, %v561_v53 }
 0x195   :  { %v551_v58 = vadd.f32 %v550_v56, %v549_v54  ;;  %v564_v60 = vrot.slane %v563_v57, 2 }
 0x197   :  { %v552_v61 = vrot.slane %v551_v58, 1  ;;  %v565_v62 = vadd.f32 %v564_v60, %v563_v57 }
 0x199   :  { %v553_v63 = vadd.f32 %v552_v61, %v551_v58  ;;  %v566_v0 = vrot.slane %v565_v62, 1 }
 0x19b   :  { %v554_v1 = vmul.f32 0.03125, %v553_v63  ;;  %v567_v2 = vadd.f32 %v566_v0, %v565_v62 }
 0x19d   :  { %v568_v3 = vmul.f32 0.03125, %v567_v2  ;;  %v569_v4 = vmul.f32 %v554_v1, %v554_v1 }
 0x19f   :  { %v570_v5 = vsub.f32 %v568_v3, %v569_v4 }
 0x1a1   :  { %v571_v6 = vadd.f32 1e-05, %v570_v5 }
 0x1a3   :  { %789 = vrsqrt.f32 %v571_v6  ;;  %vm578_vm7 = vweird.f32 %v571_v6 }
 0x1a9   :  { %v790_v7 = vpop.eup %789 }
 0x1aa   :  { %v573_v43 = vmul.f32 %v790_v7, %v571_v6  ;;  %vm579_vm6 = vweird.f32 %v790_v7 }
 0x1ab   :  { %vm580_vm8 = vmor %vm578_vm7, %vm579_vm6 }
 0x1ac   :  { %v574_v45 = vmul.f32 %v790_v7, %v573_v43 }
 0x1ae   :  { %v575_v46 = vmul.f32 0.5, %v574_v45 }
 0x1b0   :  { %v576_v59 = vsub.f32 1.5, %v575_v46 }
 0x1b2   :  { %v577_v9 = vmul.f32 %v790_v7, %v576_v59 }
 0x1b4   :  { %v581_v11 = vsel %vm580_vm8, %v790_v7, %v577_v9 }
 0x1b5   :  { %v582_v12 = vmul.f32 %v581_v11, %v543_v8 }
 0x1b7   :  { %v583_v15 = vmul.f32 %v582_v12, %v554_v1  ;;  %v586_v16 = vperm.slane %v582_v12, 0 }
 0x1b9   :  { %v584_v13 = vsub.f32 %v544_v14, %v583_v15  ;;  %v588_v21 = vmul.f32 %v586_v16, %v539_v33  ;;  %v589_v22 = vmul.f32 %v586_v16, %v540_v31  ;;  %v590_v23 = vmul.f32 %v586_v16, %v541_v34 }
 0x1ba   :  { %v591_v24 = vmul.f32 %v586_v16, %v542_v48 }
 0x1bb   :  { %v593_v25 = vperm.slane %v584_v13, 0 }
 0x1bd   :  { %v595_v29 = vadd.f32 %v593_v25, %v588_v21  ;;  %v596_v30 = vadd.f32 %v593_v25, %v589_v22  ;;  %v597_v32 = vadd.f32 %v593_v25, %v590_v23  ;;  %v598_v35 = vadd.f32 %v593_v25, %v591_v24 }
 0x1bf   :  { %v603_v37 = vadd.f32 %v595_v29, %v65_v26  ;;  %v604_v38 = vadd.f32 %v596_v30, %v67_v27  ;;  %v605_v39 = vadd.f32 %v597_v32, %v70_v28  ;;  %v606_v33 = vadd.f32 %v598_v35, %v72_v36 }
 0x1c1   :  { %607 = vst [vmem:[%s1046_s9] sm:$0xff] %v603_v37 }
 0x1c2   :  { %608 = vst [vmem:[%s1046_s9 + $0x8] sm:$0xff] %v604_v38 }
 0x1c3   :  { %609 = vst [vmem:[%s1046_s9 + $0x10] sm:$0xff] %v605_v39 }
 0x1c4   :  { %610 = vst [vmem:[%s1046_s9 + $0x18] sm:$0xff] %v606_v33 }

</bundles_post_ra>
